<compile_context>
chip_gen: v7x
topology: tpu7x:2x2x1
jax: 0.10.0
libtpu: 0.0.40
codegen_flags: <defaults>
</compile_context>

<pallas_src>
import functools
import math

import jax
import jax.numpy as jnp
import numpy as np
from jax.experimental import pallas as pl
from jax.experimental.pallas import tpu as pltpu


_VMEM_BUDGET_BYTES = 24 * 1024 * 1024   # target for the double-buffered working set
_VMEM_LIMIT_BYTES = 40 * 1024 * 1024    # above the 16/32 MiB defaults, below v7x's 64 MiB/TC


def _pe_add_kernel(pe_ref, x_ref, o_ref):
    # pe_ref: (TS, D); x_ref/o_ref: (TS, B, D).  Broadcast pe over the batch axis.
    o_ref[...] = x_ref[...] + pe_ref[...][:, None, :]


def _pe_add_dropout_kernel(pe_ref, x_ref, bits_ref, o_ref, *, threshold, scale):
    xpe = x_ref[...] + pe_ref[...][:, None, :]
    keep = bits_ref[...] >= np.uint32(threshold)          # Bernoulli(1-p) keep mask
    scaled = xpe * jnp.asarray(scale, dtype=xpe.dtype)    # 1/(1-p) inverted-dropout scale
    o_ref[...] = jnp.where(keep, scaled, jnp.zeros_like(scaled))


def _choose_tile_rows(S, B, D, x_itemsize, with_bits):
    """Largest seq-tile whose double-buffered blocks fit the VMEM budget."""
    # Sublane granule constraint comes from the pe block (its second-to-last
    # dim is TS); x/out/bits blocks take (B, D) at full extent so they are free.
    granule = {4: 8, 2: 16, 1: 32}.get(x_itemsize, 8)
    row_bytes = B * D * x_itemsize * 2 + D * x_itemsize     # x in + out + pe
    if with_bits:
        row_bytes += B * D * 4                              # uint32 dropout bits
    row_bytes *= 2                                          # double buffering
    ts = max(1, _VMEM_BUDGET_BYTES // row_bytes)
    ts = max(granule, (ts // granule) * granule)
    ts = min(ts, -(-S // granule) * granule)                # never more than covers S
    return ts


def make_positional_encoding(d_model: int, dropout: float = 0.1, max_len: int = 5000):
    """Returns (pe_table, apply_fn). pe_table is [max_len, d_model] float32."""
    position = jnp.arange(max_len, dtype=jnp.float32)[:, None]            # (max_len, 1)
    div_term = jnp.exp(
        jnp.arange(0, d_model, 2, dtype=jnp.float32) * (-math.log(10000.0) / d_model)
    )
    ang = position * div_term                                              # (max_len, ceil(d/2))
    pe = jnp.zeros((max_len, d_model), dtype=jnp.float32)
    pe = pe.at[:, 0::2].set(jnp.sin(ang))
    pe = pe.at[:, 1::2].set(jnp.cos(ang)[:, : d_model // 2])

    p = float(dropout)

    def apply(x, *, training: bool = False, rng=None):
        # x: [seq_len, batch, d_model]
        S, B, D = x.shape
        assert D == d_model
        assert S <= max_len
        x_itemsize = jnp.dtype(x.dtype).itemsize
        use_dropout = bool(training) and p > 0.0

        # Keep pe in x.dtype: avoids promoting every x element to f32 and
        # halves pe DMA bytes for bf16 activations.
        pe_t = pe.astype(x.dtype)

        ts = _choose_tile_rows(S, B, D, x_itemsize, use_dropout)
        grid = (pl.cdiv(S, ts),)

        pe_spec = pl.BlockSpec((ts, D), lambda i: (i, 0))
        x_spec = pl.BlockSpec((ts, B, D), lambda i: (i, 0, 0))

        in_specs = [pe_spec, x_spec]
        args = [pe_t, x]
        if use_dropout:
            if rng is None:
                rng = jax.random.PRNGKey(0)
            bits = jax.random.bits(rng, (S, B, D), dtype=jnp.uint32)
            if p >= 1.0:
                threshold, scale = (1 << 32) - 1, 0.0
            else:
                threshold = min(int(round(p * float(1 << 32))), (1 << 32) - 1)
                scale = 1.0 / (1.0 - p)
            kernel = functools.partial(
                _pe_add_dropout_kernel, threshold=threshold, scale=scale
            )
            in_specs.append(pl.BlockSpec((ts, B, D), lambda i: (i, 0, 0)))
            args.append(bits)
        else:
            kernel = _pe_add_kernel

        return pl.pallas_call(
            kernel,
            out_shape=jax.ShapeDtypeStruct((S, B, D), x.dtype),
            grid=grid,
            in_specs=in_specs,
            out_specs=pl.BlockSpec((ts, B, D), lambda i: (i, 0, 0)),
            input_output_aliases={1: 0},   # output aliases x (same shape/dtype)
            compiler_params=pltpu.CompilerParams(
                dimension_semantics=("parallel",),
                vmem_limit_bytes=_VMEM_LIMIT_BYTES,
            ),
        )(*args)

    return pe, apply


if __name__ == "__main__":
    d_model = 32
    seq_len = 8
    batch = 2
    drop_p = 0.1

    key = jax.random.PRNGKey(0)
    x = jax.random.normal(key, (seq_len, batch, d_model), dtype=jnp.float32)

    pe_table, pos_enc = make_positional_encoding(d_model, dropout=drop_p, max_len=256)

    # Plain-JAX reference (computed before the kernel calls).
    ref = x + pe_table[:seq_len][:, None, :]

    # Eval-mode forward (dropout is identity -> deterministic, matches torch eval()).
    out = jax.block_until_ready(pos_enc(x, training=False))
    assert out.shape == (seq_len, batch, d_model)
    assert jnp.allclose(out, ref, atol=1e-6, rtol=1e-6)

    # Train-mode forward: every element is either dropped (0) or (x+pe)/(1-p).
    out_train = jax.block_until_ready(
        pos_enc(x, training=True, rng=jax.random.PRNGKey(42))
    )
    assert out_train.shape == (seq_len, batch, d_model)
    scale = 1.0 / (1.0 - drop_p)
    ok = jnp.all(
        jnp.where(
            out_train == 0,
            True,
            jnp.isclose(out_train, ref * scale, atol=1e-5, rtol=1e-5),
        )
    )
    assert bool(ok)

    print("KERNEL_OK")
</pallas_src>

<mosaic_0001>
module attributes {stable_mosaic.version = 11 : i64} {
  func.func @_pe_add_kernel(%arg0: i32, %arg1: memref<8x32xf32, #tpu.memory_space<vmem>>, %arg2: memref<8x2x32xf32, #tpu.memory_space<vmem>>, %arg3: memref<8x2x32xf32, #tpu.memory_space<vmem>>) attributes {dimension_semantics = [#tpu.dimension_semantics<parallel>], iteration_bounds = array<i64: 1>, scalar_prefetch = 0 : i64, scratch_operands = 0 : i64, tpu.core_type = #tpu.core_type<tc>, window_params = [{transform_indices = @transform_0, window_bounds = array<i64: 8, 32>}, {transform_indices = @transform_1, window_bounds = array<i64: 8, 2, 32>}, {transform_indices = @transform_2, window_bounds = array<i64: 8, 2, 32>}]} {
    %c0 = arith.constant 0 : index
    %c0_0 = arith.constant 0 : index
    %c0_1 = arith.constant 0 : index
    %0 = vector.load %arg2[%c0, %c0_0, %c0_1] : memref<8x2x32xf32, #tpu.memory_space<vmem>>, vector<8x2x32xf32>
    %c0_2 = arith.constant 0 : index
    %c0_3 = arith.constant 0 : index
    %1 = vector.load %arg1[%c0_2, %c0_3] : memref<8x32xf32, #tpu.memory_space<vmem>>, vector<8x32xf32>
    %2 = vector.shape_cast %1 : vector<8x32xf32> to vector<8x1x32xf32>
    %3 = vector.broadcast %2 : vector<8x1x32xf32> to vector<8x2x32xf32>
    %4 = arith.addf %0, %3 : vector<8x2x32xf32>
    %c0_4 = arith.constant 0 : index
    %c0_5 = arith.constant 0 : index
    %c0_6 = arith.constant 0 : index
    %5 = vector.load %arg3[%c0_4, %c0_5, %c0_6] : memref<8x2x32xf32, #tpu.memory_space<vmem>>, vector<8x2x32xf32>
    tpu.vector_store %arg3[%c0_4, %c0_5, %c0_6], %4 {strides = array<i32>} : memref<8x2x32xf32, #tpu.memory_space<vmem>>, vector<8x2x32xf32>,
    return
  }
  func.func @transform_0(%arg0: i32) -> (i32, i32) {
    %c0_i32 = arith.constant 0 : i32
    %c0_i32_0 = arith.constant 0 : i32
    return %arg0, %c0_i32 : i32, i32
  }
  func.func @transform_1(%arg0: i32) -> (i32, i32, i32) {
    %c0_i32 = arith.constant 0 : i32
    %c0_i32_0 = arith.constant 0 : i32
    %c0_i32_1 = arith.constant 0 : i32
    return %arg0, %c0_i32, %c0_i32_0 : i32, i32, i32
  }
  func.func @transform_2(%arg0: i32) -> (i32, i32, i32) {
    %c0_i32 = arith.constant 0 : i32
    %c0_i32_0 = arith.constant 0 : i32
    %c0_i32_1 = arith.constant 0 : i32
    return %arg0, %c0_i32, %c0_i32_0 : i32, i32, i32
  }
}

</mosaic_0001>

<bundles_post_ra>
// kernel: tpu_custom_call.1
= control target key start
LH: loop header
LB: loop body
LE: loop exit
PB: predicated region body
PF: predicated region fallthrough
CT: control target
= control target key end

     0   :  { %7 = vsyncpa [#allocation3], 0  ;;  %s273_s0 = inlined_call_operand.vmem [shape: f32[256,32], index: 0, kind: input, shape index: {}]   ;;  %s274_s1 = inlined_call_operand.hbm [shape: f32[8,2,32], index: 1, kind: input, shape index: {}, may-alias: {1,2}]   ;;  %s275_s2 = inlined_call_operand.hbm [shape: f32[8,2,32], index: 2, kind: output, shape index: {}, may-alias: {1,2}]  }
   0x1   :  { %8 = vsyncpa [#allocation4], 0  ;;  %s212_s9 = smov [#allocation2]   ;;  %s164_s13 = scalar_lea.hbm %s274_s1, 256 }
   0x2   :  { %s16_s10 = sshll.u32 %s212_s9, 4  ;;  %p165_p0 = scmp.ne.s32.totalorder %s274_s1, %s164_s13  ;;  %s17_s10 = int_to_ptr.vmem [resolvable:$true] %s16_s10 }
   0x3   :  { %p168_p1 = scmp.lt.u32.totalorder %s164_s13, %s274_s1 }
   0x5   :  { %p170_p2 = pnand %p168_p1, %p165_p0 }
   0x7   :  { %173 = shalt.err (!%p170_p2)
}
   0x8   :  { %s174_s18 = scalar_lea.vmem %s17_s10, 256  ;;  %p179_p4 = scmp.lt.s32.totalorder %s17_s10, %s17_s10 }
   0x9   :  { %p175_p3 = scmp.ne.s32.totalorder %s17_s10, %s174_s18  ;;  %p180_p5 = scmp.lt.s32.totalorder %s174_s18, %s174_s18 }
   0xb   :  { %p181_p6 = por %p180_p5, %p179_p4 }
   0xd   :  { %p182_p7 = pnand %p181_p6, %p175_p3 }
   0xf   :  { %185 = shalt.err (!%p182_p7)
}
  0x10   :  { %s213_s19 = smov 32   ;;  %s214_s20 = smov 2  }
  0x11   :  { %22 = dma.hbm_to_vmem [thread:$0]  %s274_s1, 256, %s17_s10, [#allocation3], %s213_s19, %s213_s19, %s214_s20  }
  0x12   :  { %208 = dma.done.wait [#allocation3], 256  }
  0x13   :  { %209 = vsyncadd [#allocation3], 4294967040  ;;  %v40_v0 = vlaneseq  ;;  %v215_v1 = vmov 1966171168   ;;  %v34_v6 = vld [vmem:[%s273_s0] sm:$0xff]  ;;  %vm133_vm0 = vcmask 254976  }
  0x14   :  { %v38_v2 = vunpack.c.l.s4 %v215_v1  ;;  %v36_v9 = vcombine.high %v34_v6, %v34_v6  ;;  %v26_v13 = vld [vmem:[#allocation2] sm:$0x3]  ;;  %v27_v18 = vld [vmem:[#allocation2 + $0x2] sm:$0x3]  ;;  %v28_v19 = vld [vmem:[#allocation2 + $0x4] sm:$0x3] }
  0x15   :  { %v41_v3 = vshrl.u32 %v40_v0, 7  ;;  %v30_v25 = vld [vmem:[#allocation2 + $0x8] sm:$0x3]  ;;  %v29_v26 = vld [vmem:[#allocation2 + $0x6] sm:$0x3]  ;;  %s216_s0 = smov [#allocation5]  }
  0x16   :  { %v39_v4 = vunpack.c.0.s8 %v38_v2  ;;  %v31_v33 = vld [vmem:[#allocation2 + $0xa] sm:$0x3]  ;;  %v32_v34 = vld [vmem:[#allocation2 + $0xc] sm:$0x3]  ;;  %v33_v40 = vld [vmem:[#allocation2 + $0xe] sm:$0x3] }
  0x17   :  { %v87_v8 = vsub.s32 0, %v41_v3  ;;  %s147_s1 = sshll.u32 %s216_s0, 4  ;;  %s148_s1 = int_to_ptr.vmem [resolvable:$true] %s147_s1 }
  0x18   :  { %v42_v5 = vsub.s32 %v39_v4, %v41_v3  ;;  %s186_s25 = scalar_lea.vmem %s148_s1, 256  ;;  %p191_p9 = scmp.lt.s32.totalorder %s148_s1, %s148_s1 }
  0x19   :  { %p187_p8 = scmp.ne.s32.totalorder %s148_s1, %s186_s25  ;;  %p192_p10 = scmp.lt.s32.totalorder %s186_s25, %s186_s25 }
  0x1a   :  { %v43_v7 = vrot.slane %v34_v6, %v42_v5  ;;  %v50_v12 = vrot.slane %v36_v9, %v42_v5 }
  0x1b   :  { %p193_p11 = por %p192_p10, %p191_p9 }
  0x1c   :  { %v59_v10 = vrot.slane %v43_v7, %v42_v5  ;;  %v51_v11 = vcombine.high %v43_v7, %v43_v7  ;;  %v66_v17 = vrot.slane %v50_v12, %v42_v5  ;;  %v52_v20 = vcombine.high %v50_v12, %v50_v12 }
  0x1d   :  { %p194_p12 = pnand %p193_p11, %p187_p8 }
  0x1e   :  { %v88_v14 = vrot.slane %v59_v10, %v87_v8  ;;  %v73_v15 = vrot.slane %v51_v11, %v42_v5  ;;  %v81_v16 = vcombine.high %v59_v10, %v59_v10  ;;  %v104_v27 = vrot.slane %v66_v17, %v87_v8 }
  0x1f   :  { %v80_v28 = vrot.slane %v52_v20, %v42_v5  ;;  %v82_v29 = vcombine.high %v66_v17, %v66_v17 }
  0x20   :  { %v125_v21 = vadd.f32 %v88_v14, %v26_v13  ;;  %v92_v22 = vrot.slane %v73_v15, %v87_v8  ;;  %v96_v23 = vrot.slane %v81_v16, %v87_v8  ;;  %v83_v24 = vcombine.high %v73_v15, %v73_v15 }
  0x21   :  { %v129_v35 = vadd.f32 %v104_v27, %v30_v25  ;;  %v108_v36 = vrot.slane %v80_v28, %v87_v8  ;;  %v112_v37 = vrot.slane %v82_v29, %v87_v8  ;;  %v84_v38 = vcombine.high %v80_v28, %v80_v28 }
  0x22   :  { %134 = vst.msk [vmem:[#allocation5] sm:$0x3] %vm133_vm0, %v125_v21  ;;  %v126_v30 = vadd.f32 %v92_v22, %v27_v18  ;;  %v127_v31 = vadd.f32 %v96_v23, %v28_v19  ;;  %v100_v32 = vrot.slane %v83_v24, %v87_v8 }
  0x23   :  { %138 = vst.msk [vmem:[#allocation5 + $0x8] sm:$0x3] %vm133_vm0, %v129_v35  ;;  %v130_v41 = vadd.f32 %v108_v36, %v31_v33  ;;  %v131_v42 = vadd.f32 %v112_v37, %v32_v34  ;;  %v116_v43 = vrot.slane %v84_v38, %v87_v8 }
  0x24   :  { %135 = vst.msk [vmem:[#allocation5 + $0x2] sm:$0x3] %vm133_vm0, %v126_v30  ;;  %136 = vst.msk [vmem:[#allocation5 + $0x4] sm:$0x3] %vm133_vm0, %v127_v31  ;;  %v128_v39 = vadd.f32 %v100_v32, %v29_v26 }
  0x25   :  { %139 = vst.msk [vmem:[#allocation5 + $0xa] sm:$0x3] %vm133_vm0, %v130_v41  ;;  %140 = vst.msk [vmem:[#allocation5 + $0xc] sm:$0x3] %vm133_vm0, %v131_v42  ;;  %v132_v44 = vadd.f32 %v116_v43, %v33_v40 }
  0x26   :  { %137 = vst.msk [vmem:[#allocation5 + $0x6] sm:$0x3] %vm133_vm0, %v128_v39 }
  0x27   :  { %141 = vst.msk [vmem:[#allocation5 + $0xe] sm:$0x3] %vm133_vm0, %v132_v44 }
  0x28   :  { %197 = shalt.err (!%p194_p12)
}
  0x29   :  { %s198_s28 = scalar_lea.hbm %s275_s2, 256 }
  0x2a   :  { %p199_p13 = scmp.ne.s32.totalorder %s275_s2, %s198_s28  ;;  %p202_p0 = scmp.lt.u32.totalorder %s198_s28, %s275_s2 }
  0x2c   :  { %p204_p1 = pnand %p202_p0, %p199_p13 }
  0x2e   :  { %207 = shalt.err (!%p204_p1)
}
  0x2f   :  { %153 = dma.vmem_to_hbm [thread:$0]  %s148_s1, 256, %s275_s2, [#allocation4], %s213_s19, %s213_s19, %s214_s20  }
  0x30   :  { %210 = dma.done.wait [#allocation4], 256  }
  0x31   :  { %211 = vsyncadd [#allocation4], 4294967040 }
  0x32   :  { %157 = vsyncpa [#allocation3], 1 }
  0x33   :  { %158 = vsyncpa [#allocation4], 1 }

</bundles_post_ra>
